<compile_context>
chip_gen: v7x
topology: tpu7x:2x2x1
jax: 0.10.0
libtpu: 0.0.40
codegen_flags: <defaults>
</compile_context>

<pallas_src>
import functools
import math

import jax
import jax.numpy as jnp
from jax import lax
from jax.experimental import pallas as pl
from jax.experimental.pallas import tpu as pltpu


def _round_up(x, m):
    return (x + m - 1) // m * m


# ---------------------------------------------------------------------------
# Pallas kernel 1: fused Conv2d(KxK, same) + per-channel affine + optional ReLU
# ---------------------------------------------------------------------------
def _conv_affine_kernel(x_ref, w_ref, scale_ref, shift_ref, o_ref,
                        *, K, Wp, TR, relu):
    t = pl.program_id(0)              # row-tile index (cout tile handled by BlockSpec)
    base = t * TR
    acc = jnp.zeros(o_ref.shape, jnp.float32)
    for s in range(K * K):            # statically unrolled tap loop
        dy, dx = divmod(s, K)
        x_blk = x_ref[pl.ds(base + dy * Wp + dx, TR), :]        # (TR, Cin) bf16
        acc = acc + jnp.dot(x_blk, w_ref[s],
                            preferred_element_type=jnp.float32)  # (TR, TN) f32
    y = acc * scale_ref[...] + shift_ref[...]
    if relu:
        y = jnp.maximum(y, 0.0)
    o_ref[...] = y.astype(o_ref.dtype)


@functools.partial(jax.jit, static_argnames=("relu",))
def conv2d_affine(x, w, scale, shift, *, relu):
    """x: (N,H,W,Cin) channels-last; w: (K,K,Cin,Cout) HWIO.

    Computes Conv2d(stride 1, padding K//2) followed by y*scale + shift and an
    optional ReLU.  Matmul operands are bf16, accumulation f32.  Returns
    (N,H,W,Cout) f32.
    """
    N, H, W, Cin = x.shape
    K = w.shape[0]
    Cout = w.shape[-1]
    p = K // 2
    Hp, Wp = H + 2 * p, W + 2 * p
    pad_flat = p * Wp + p                      # flat-index shift margin

    R = N * Hp * Wp                            # flattened padded rows we need
    TR = min(512, _round_up(R, 8))             # row-tile size (multiple of 8)
    R_pad = _round_up(R, TR)
    M = R_pad + 2 * pad_flat                   # total rows incl. shift margins

    Cout_pad = _round_up(Cout, 128)            # lane-dense output stores
    TN = min(256, Cout_pad)                    # Cout tile (multiple of 128)

    # bf16 operands; zero-pad spatially, flatten rows, add tap-shift margins.
    xp = jnp.pad(x.astype(jnp.bfloat16), ((0, 0), (p, p), (p, p), (0, 0)))
    x_all = jnp.pad(xp.reshape(R, Cin), ((pad_flat, M - pad_flat - R), (0, 0)))

    w_taps = w.astype(jnp.bfloat16).reshape(K * K, Cin, Cout)
    scale = scale.astype(jnp.float32)
    shift = shift.astype(jnp.float32)
    if Cout_pad != Cout:
        w_taps = jnp.pad(w_taps, ((0, 0), (0, 0), (0, Cout_pad - Cout)))
        scale = jnp.pad(scale, (0, Cout_pad - Cout))
        shift = jnp.pad(shift, (0, Cout_pad - Cout))
    scale2 = scale.reshape(1, Cout_pad)
    shift2 = shift.reshape(1, Cout_pad)

    kernel = functools.partial(_conv_affine_kernel, K=K, Wp=Wp, TR=TR, relu=relu)

    # Per-layer VMEM budget (double-buffered bf16 x / w, f32 out + acc), clamped
    # so we never ask for more than 48 MiB (v7x has 64 MiB physical VMEM).
    est = (2 * M * Cin * 2 + 2 * K * K * Cin * TN * 2
           + 3 * TR * TN * 4 + 4 * TN * 4)
    vmem_limit = int(min(max(2 * est, 32 << 20), 48 << 20))

    out_flat = pl.pallas_call(
        kernel,
        out_shape=jax.ShapeDtypeStruct((R_pad, Cout_pad), jnp.float32),
        grid_spec=pltpu.PrefetchScalarGridSpec(
            num_scalar_prefetch=0,
            grid=(R_pad // TR, Cout_pad // TN),
            in_specs=[
                pl.BlockSpec((M, Cin), lambda t, c: (0, 0)),             # resident
                pl.BlockSpec((K * K, Cin, TN), lambda t, c: (0, 0, c)),  # streamed
                pl.BlockSpec((1, TN), lambda t, c: (0, c)),
                pl.BlockSpec((1, TN), lambda t, c: (0, c)),
            ],
            out_specs=pl.BlockSpec((TR, TN), lambda t, c: (t, c)),
        ),
        compiler_params=pltpu.CompilerParams(
            dimension_semantics=("parallel", "parallel"),
            vmem_limit_bytes=vmem_limit,
        ),
    )(x_all, w_taps, scale2, shift2)

    out = out_flat[:R, :Cout].reshape(N, Hp, Wp, Cout)
    return out[:, p:p + H, p:p + W, :]


# ---------------------------------------------------------------------------
# Pallas kernel 2: MaxPool2d(2) — no XLA transpose, only a free reshape
# ---------------------------------------------------------------------------
def _maxpool_kernel(x_ref, o_ref):
    x = x_ref[...]                      # (TB, 2, W2, 2, C)
    m = jnp.max(x, axis=3)              # (TB, 2, W2, C)
    o_ref[...] = jnp.max(m, axis=1)     # (TB, W2, C)


@jax.jit
def maxpool2x2(x):
    """Channels-last 2x2 max pool: (N,H,W,C) -> (N,H/2,W/2,C)."""
    N, H, W, C = x.shape
    H2, W2 = H // 2, W // 2
    NH2 = N * H2
    y = x.reshape(NH2, 2, W2, 2, C)          # pure reshape, no data movement

    row_bytes = 2 * W2 * 2 * C * x.dtype.itemsize
    tb = max(1, min(NH2, (2 << 20) // max(row_bytes, 1)))
    while NH2 % tb:                           # pick a divisor -> no padding glue
        tb -= 1

    out = pl.pallas_call(
        _maxpool_kernel,
        out_shape=jax.ShapeDtypeStruct((NH2, W2, C), x.dtype),
        grid_spec=pltpu.PrefetchScalarGridSpec(
            num_scalar_prefetch=0,
            grid=(NH2 // tb,),
            in_specs=[pl.BlockSpec((tb, 2, W2, 2, C),
                                   lambda t: (t, 0, 0, 0, 0))],
            out_specs=pl.BlockSpec((tb, W2, C), lambda t: (t, 0, 0)),
        ),
        compiler_params=pltpu.CompilerParams(
            dimension_semantics=("parallel",)),
    )(y)
    return out.reshape(N, H2, W2, C)


# ---------------------------------------------------------------------------
# Pure layout ops (XLA): PixelShuffle(2), PixelStack(2)
# ---------------------------------------------------------------------------
def pixel_shuffle2(x):
    """Channels-last PixelShuffle(2): (N,H,W,4c) -> (N,2H,2W,c)."""
    N, H, W, C = x.shape
    c = C // 4
    y = x.reshape(N, H, W, c, 2, 2).transpose(0, 1, 4, 2, 5, 3)
    return y.reshape(N, 2 * H, 2 * W, c)


def pixel_stack2(x):
    """Channels-last PixelStack(2) (squeeze2d): (N,H,W,c) -> (N,H/2,W/2,4c)."""
    N, H, W, C = x.shape
    H2, W2 = H // 2, W // 2
    y = x.reshape(N, H2, 2, W2, 2, C).transpose(0, 1, 3, 5, 2, 4)
    return y.reshape(N, H2, W2, C * 4)


# ---------------------------------------------------------------------------
# Parameters and BN folding
# ---------------------------------------------------------------------------
def _conv_params(key, cin, cout, k):
    kw, kb = jax.random.split(key)
    std = math.sqrt(2.0 / (cin * k * k))
    w = (std * jax.random.normal(kw, (k, k, cin, cout), jnp.float32))
    return {"w": w.astype(jnp.bfloat16),                 # stored bf16 (MXU-native)
            "b": 0.01 * jax.random.normal(kb, (cout,), jnp.float32)}


def _bn_params(key, c):
    kg, kb = jax.random.split(key)
    return {"gamma": 1.0 + 0.05 * jax.random.normal(kg, (c,), jnp.float32),
            "beta": 0.05 * jax.random.normal(kb, (c,), jnp.float32),
            "mean": jnp.zeros((c,), jnp.float32),
            "var": jnp.ones((c,), jnp.float32)}


def _affine_from(conv, bn, eps=1e-5):
    if bn is None:
        return jnp.ones_like(conv["b"]), conv["b"]
    inv = bn["gamma"] / jnp.sqrt(bn["var"] + eps)
    return inv, bn["beta"] + (conv["b"] - bn["mean"]) * inv


def init_unet_params(key, in_channels, out_channels, k):
    keys = iter(jax.random.split(key, 200))

    def dc(cin, cout, ksz):
        return {"conv1": _conv_params(next(keys), cin, cout, ksz),
                "bn1": _bn_params(next(keys), cout),
                "conv2": _conv_params(next(keys), cout, cout, ksz),
                "bn2": _bn_params(next(keys), cout)}

    def up_p(cin, cout, ksz):
        return {"up_conv": _conv_params(next(keys), cin // 4, cin // 2, ksz),
                "conv": dc(cin, cout, 3)}  # Up's DoubleConv uses default k=3

    return {
        "in_conv": dc(in_channels, 64, k),
        "down1": dc(64, 128, k), "down2": dc(128, 256, k),
        "down3": dc(256, 512, k), "down4": dc(512, 1024, k),
        "down5": dc(1024, 2048, k),
        "up5": up_p(2048, 1024, k), "up4": up_p(1024, 512, k),
        "up3": up_p(512, 256, k), "up2": up_p(256, 128, k),
        "up1": up_p(128, 64, k),
        "out_layer1": {"conv": _conv_params(next(keys), 256, 64, k)},
        "out_layer2": {"conv": _conv_params(next(keys), 256, 64, k)},
        "out_layer3": {"conv": _conv_params(next(keys), 256, 64, k)},
        "out_layer4": {"conv": _conv_params(next(keys), 64, 8, k)},
        "out_layer5": {"conv": _conv_params(next(keys), 8, out_channels, k)},
    }


# ---------------------------------------------------------------------------
# Conv back-ends: Pallas and plain-JAX reference
# ---------------------------------------------------------------------------
def pallas_conv(x, conv, bn, relu):
    scale, shift = _affine_from(conv, bn)
    w = conv["w"]
    K, _, Cin, Cout = w.shape
    if K > 1 and Cin <= 8:
        # im2col: fold the K*K taps into the channel dim; one lane-dense matmul
        # instead of K*K nearly-empty MXU passes (Cin=3 stem, Cin=8 head).
        p = K // 2
        N, H, W, _ = x.shape
        xp = jnp.pad(x, ((0, 0), (p, p), (p, p), (0, 0)))
        x = jnp.concatenate(
            [xp[:, dy:dy + H, dx:dx + W, :]
             for dy in range(K) for dx in range(K)], axis=-1)
        w = w.reshape(1, 1, K * K * Cin, Cout)
    return conv2d_affine(x, w, scale, shift, relu=relu)


def ref_conv(x, conv, bn, relu):
    # Reference uses the same bf16 operand precision (f32 accumulation) as the
    # Pallas path so the comparison isolates kernel correctness.
    y = lax.conv_general_dilated(
        x.astype(jnp.bfloat16), conv["w"].astype(jnp.bfloat16),
        window_strides=(1, 1), padding="SAME",
        dimension_numbers=("NHWC", "HWIO", "NHWC"),
        preferred_element_type=jnp.float32)
    scale, shift = _affine_from(conv, bn)
    y = y * scale + shift
    return jnp.maximum(y, 0.0) if relu else y


def ref_maxpool(x):
    N, H, W, C = x.shape
    return x.reshape(N, H // 2, 2, W // 2, 2, C).max(axis=(2, 4))


# ---------------------------------------------------------------------------
# UNetBased forward (channels-last), parameterized by conv / pool back-end
# ---------------------------------------------------------------------------
def double_conv(x, p, conv_fn):
    x = conv_fn(x, p["conv1"], p["bn1"], True)
    return conv_fn(x, p["conv2"], p["bn2"], True)


def down(x, p, conv_fn, pool_fn):
    return double_conv(pool_fn(x), p, conv_fn)


def up(x1, x2, p, conv_fn):
    x1 = pixel_shuffle2(x1)
    x1 = conv_fn(x1, p["up_conv"], None, False)      # conv only, no ReLU
    dh = x2.shape[1] - x1.shape[1]
    dw = x2.shape[2] - x1.shape[2]
    x1 = jnp.pad(x1, ((0, 0), (dh // 2, dh - dh // 2),
                      (dw // 2, dw - dw // 2), (0, 0)))
    x = jnp.concatenate([x2, x1], axis=-1)           # cat([x2, x1], dim=C)
    return double_conv(x, p["conv"], conv_fn)


def conv_relu(x, p, conv_fn):
    return conv_fn(x, p["conv"], None, True)


def unet_forward(x, params, conv_fn, pool_fn):
    x1 = double_conv(x, params["in_conv"], conv_fn)
    x2 = down(x1, params["down1"], conv_fn, pool_fn)
    x3 = down(x2, params["down2"], conv_fn, pool_fn)
    x4 = down(x3, params["down3"], conv_fn, pool_fn)
    x5 = down(x4, params["down4"], conv_fn, pool_fn)
    x6 = down(x5, params["down5"], conv_fn, pool_fn)
    out = up(x6, x5, params["up5"], conv_fn)
    out = up(out, x4, params["up4"], conv_fn)
    out = up(out, x3, params["up3"], conv_fn)
    out = up(out, x2, params["up2"], conv_fn)
    out = up(out, x1, params["up1"], conv_fn)
    out = conv_relu(pixel_stack2(out), params["out_layer1"], conv_fn)
    out = conv_relu(pixel_stack2(out), params["out_layer2"], conv_fn)
    out = conv_relu(pixel_stack2(out), params["out_layer3"], conv_fn)
    out = conv_relu(out, params["out_layer4"], conv_fn)
    out = conv_relu(out, params["out_layer5"], conv_fn)
    return out


if __name__ == "__main__":
    in_channels, out_channels, kernel_size = 3, 3, 3
    N, H, W = 1, 32, 32                          # must be divisible by 32

    root = jax.random.PRNGKey(0)
    kp, kx = jax.random.split(root)
    params = init_unet_params(kp, in_channels, out_channels, kernel_size)
    x_nchw = jax.random.normal(kx, (N, in_channels, H, W), jnp.float32)
    x = jnp.transpose(x_nchw, (0, 2, 3, 1))      # NCHW -> NHWC (channels-last)

    pallas_model = jax.jit(lambda xx, pp: unet_forward(xx, pp, pallas_conv, maxpool2x2))
    ref_model = jax.jit(lambda xx, pp: unet_forward(xx, pp, ref_conv, ref_maxpool))

    out = jax.block_until_ready(pallas_model(x, params))
    ref = jax.block_until_ready(ref_model(x, params))

    out_nchw = jnp.transpose(out, (0, 3, 1, 2))
    assert out_nchw.shape == (N, out_channels, H // 8, W // 8), out_nchw.shape
    assert out.shape == ref.shape
    assert bool(jnp.all(jnp.isfinite(out)))

    max_err = float(jnp.max(jnp.abs(out - ref)))
    tol = 2e-2 * float(jnp.max(jnp.abs(ref))) + 1e-3
    assert max_err <= tol, f"mismatch vs reference: max_err={max_err}, tol={tol}"

    print("KERNEL_OK")
</pallas_src>

<mosaic_0001>
module attributes {stable_mosaic.version = 11 : i64} {
  func.func @_conv_affine_kernel(%arg0: i32, %arg1: i32, %arg2: memref<1024x27xbf16, #tpu.memory_space<vmem>>, %arg3: memref<1x27x128xbf16, #tpu.memory_space<vmem>>, %arg4: memref<1x128xf32, #tpu.memory_space<vmem>>, %arg5: memref<1x128xf32, #tpu.memory_space<vmem>>, %arg6: memref<512x128xf32, #tpu.memory_space<vmem>>) attributes {dimension_semantics = [#tpu.dimension_semantics<parallel>, #tpu.dimension_semantics<parallel>], iteration_bounds = array<i64: 2, 1>, scalar_prefetch = 0 : i64, scratch_operands = 0 : i64, tpu.core_type = #tpu.core_type<tc>, window_params = [{pipeline_mode = #tpu.pipeline_mode<synchronous>, transform_indices = @transform_0, window_bounds = array<i64: 1024, 27>}, {transform_indices = @transform_1, window_bounds = array<i64: 1, 27, 128>}, {transform_indices = @transform_2, window_bounds = array<i64: 1, 128>}, {transform_indices = @transform_3, window_bounds = array<i64: 1, 128>}, {transform_indices = @transform_4, window_bounds = array<i64: 512, 128>}]} {
    %c512_i32 = arith.constant 512 : i32
    %0 = arith.muli %arg0, %c512_i32 : i32
    %cst = arith.constant 0.000000e+00 : f32
    %1 = vector.broadcast %cst : f32 to vector<512x128xf32>
    %c0_i32 = arith.constant 0 : i32
    %2 = arith.addi %0, %c0_i32 : i32
    %c0_i32_0 = arith.constant 0 : i32
    %3 = arith.addi %2, %c0_i32_0 : i32
    %4 = arith.index_cast %3 : i32 to index
    %c0 = arith.constant 0 : index
    %5 = vector.load %arg2[%4, %c0] : memref<1024x27xbf16, #tpu.memory_space<vmem>>, vector<512x27xbf16>
    %c0_1 = arith.constant 0 : index
    %c0_2 = arith.constant 0 : index
    %c0_3 = arith.constant 0 : index
    %6 = vector.load %arg3[%c0_1, %c0_2, %c0_3] : memref<1x27x128xbf16, #tpu.memory_space<vmem>>, vector<1x27x128xbf16>
    %7 = vector.shape_cast %6 : vector<1x27x128xbf16> to vector<27x128xbf16>
    %cst_4 = arith.constant dense<0.000000e+00> : vector<512x128xf32>
    %8 = tpu.matmul %5, %7, %cst_4 {dimension_numbers = #tpu.dot_dimension_numbers<[1], [0], [0], [1], [0, 0, 1, 1], [], []>} : vector<512x27xbf16>, vector<27x128xbf16>, vector<512x128xf32> -> vector<512x128xf32>
    %9 = arith.addf %1, %8 : vector<512x128xf32>
    %c0_5 = arith.constant 0 : index
    %c0_6 = arith.constant 0 : index
    %10 = vector.load %arg4[%c0_5, %c0_6] : memref<1x128xf32, #tpu.memory_space<vmem>>, vector<1x128xf32>
    %11 = vector.broadcast %10 : vector<1x128xf32> to vector<512x128xf32>
    %12 = arith.mulf %9, %11 : vector<512x128xf32>
    %c0_7 = arith.constant 0 : index
    %c0_8 = arith.constant 0 : index
    %13 = vector.load %arg5[%c0_7, %c0_8] : memref<1x128xf32, #tpu.memory_space<vmem>>, vector<1x128xf32>
    %14 = vector.broadcast %13 : vector<1x128xf32> to vector<512x128xf32>
    %15 = arith.addf %12, %14 : vector<512x128xf32>
    %cst_9 = arith.constant 0.000000e+00 : f32
    %16 = vector.broadcast %cst_9 : f32 to vector<512x128xf32>
    %17 = arith.maximumf %15, %16 : vector<512x128xf32>
    %c0_10 = arith.constant 0 : index
    %c0_11 = arith.constant 0 : index
    %18 = vector.load %arg6[%c0_10, %c0_11] : memref<512x128xf32, #tpu.memory_space<vmem>>, vector<512x128xf32>
    tpu.vector_store %arg6[%c0_10, %c0_11], %17 {strides = array<i32>} : memref<512x128xf32, #tpu.memory_space<vmem>>, vector<512x128xf32>,
    return
  }
  func.func @transform_0(%arg0: i32, %arg1: i32) -> (i32, i32) {
    %c0_i32 = arith.constant 0 : i32
    %c0_i32_0 = arith.constant 0 : i32
    %c0_i32_1 = arith.constant 0 : i32
    return %c0_i32, %c0_i32_0 : i32, i32
  }
  func.func @transform_1(%arg0: i32, %arg1: i32) -> (i32, i32, i32) {
    %c0_i32 = arith.constant 0 : i32
    %c0_i32_0 = arith.constant 0 : i32
    %c0_i32_1 = arith.constant 0 : i32
    return %c0_i32, %c0_i32_0, %arg1 : i32, i32, i32
  }
  func.func @transform_2(%arg0: i32, %arg1: i32) -> (i32, i32) {
    %c0_i32 = arith.constant 0 : i32
    %c0_i32_0 = arith.constant 0 : i32
    return %c0_i32, %arg1 : i32, i32
  }
  func.func @transform_3(%arg0: i32, %arg1: i32) -> (i32, i32) {
    %c0_i32 = arith.constant 0 : i32
    %c0_i32_0 = arith.constant 0 : i32
    return %c0_i32, %arg1 : i32, i32
  }
  func.func @transform_4(%arg0: i32, %arg1: i32) -> (i32, i32) {
    %c0_i32 = arith.constant 0 : i32
    return %arg0, %arg1 : i32, i32
  }
}

</mosaic_0001>

<bundles_post_ra>
// kernel: conv2d_affine.1
= control target key start
LH: loop header
LB: loop body
LE: loop exit
PB: predicated region body
PF: predicated region fallthrough
CT: control target
= control target key end

     0   :  { %9 = vsyncpa [#allocation3], 0  ;;  %s2046_s0 = inlined_call_operand.vmem [shape: bf16[1024,27], index: 0, kind: input, shape index: {}]   ;;  %s2047_s1 = inlined_call_operand.vmem [shape: bf16[1,27,128], index: 1, kind: input, shape index: {}]   ;;  %s2048_s2 = inlined_call_operand.vmem [shape: f32[1,128], index: 2, kind: input, shape index: {}]   ;;  %s2049_s3 = inlined_call_operand.vmem [shape: f32[1,128], index: 3, kind: input, shape index: {}]   ;;  %s2050_s4 = inlined_call_operand.hbm [shape: f32[1024,128], index: 4, kind: output, shape index: {}]  }
   0x1   :  { %11 = vsyncpa [#allocation3 + $0x1], 0  ;;  %s1651_s15 = smov 0   ;;  %s1653_s16 = smov 0  }
   0x2   :  { %s1655_s17 = smov 0   ;;  %s1657_s18 = smov 0  }
   0x3   :  { %s1659_s19 = smov 0   ;;  %s1661_s20 = smov 0  }
   0x4 LB: > { %s1260_s21 = sadd.s32 4294967295, %s1620_s20   ;;  %s1261_s22 = sadd.s32 4294967294, %s1620_s20   ;;  %s1620_s20 = sphi %s1661_s20, %s17_s20   ;;  %s1616_s19 = sphi %s1659_s19, %s2057_s19   ;;  %s1612_s18 = sphi %s1657_s18, %s2056_s18   ;;  %s1608_s17 = sphi %s1655_s17, %s2055_s17   ;;  %s1604_s16 = sphi %s1653_s16, %s2054_s16   ;;  %s1600_s15 = sphi %s1651_s15, %s2053_s15  }
   0x5   : > { %s29_s23 = sadd.s32 1, %s1616_s19  ;;  %s137_s24 = sadd.s32 1, %s1608_s17 }
   0x6   : > { %p31_p0 = scmp.ge.s32.totalorder %s29_s23, 2  ;;  %p147_p1 = scmp.ne.s32.totalorder %s1608_s17, %s1604_s16 }
   0x7   : > { %p148_p2 = scmp.eq.s32.totalorder %s1260_s21, 1  ;;  %p153_p3 = scmp.ne.s32.totalorder %s1604_s16, %s1600_s15 }
   0x8   : > { %s2059_s23 = smov (%p31_p0, %s29_s23), 0  ;;  %p154_p5 = scmp.eq.s32.totalorder %s1261_s22, 1 }
   0x9   : > { %p1691_p4 = por %p148_p2, %p147_p1  ;;  %s132_s26 = ssub.s32 %s1616_s19, %s2059_s23 }
   0xa   : > { %p1266_p6 = scmp.ge.s32.totalorder %s1620_s20, 1  ;;  %p135_p7 = scmp.eq.s32.totalorder %s132_s26, 0 }
   0xb   : > { %p1698_p8 = por %p154_p5, %p153_p3  ;;  %p194_p9 = scmp.lt.s32.totalorder %s1620_s20, 3 }
   0xc   : > { %s1704_s28 = scalar_select %p135_p7, %s1608_s17, %s137_s24  }
   0xd   : > { %p195_p10 = pnand %p1266_p6, %p194_p9 }
   0xe   : > { %v1508_v0 = vld [vmem:[%s2047_s1] sm:$0xff] (!%p195_p10)   ;;  %vm578_vm0 = vcmask (!%p195_p10), 1044480   ;;  %v1509_v1 = vld [vmem:[%s2047_s1 + $0x8] sm:$0x3f] (!%p195_p10)   ;;  %vm579_vm1 = vcmask (!%p195_p10), 1045504   ;;  %s1268_s7 = sshll.u32 (!%p195_p10), %s1612_s18, 9 }
   0xf   : > { %198 = sbr.rel (%p195_p10) target bundleno = 316 (0x13c), region = 36  ;;  %1378 = vmatprep.subr.bf16.mxu0 (!%p195_p10), %v1508_v0  ;;  %1446 = vmatprep.subr.bf16.mxu1 (!%p195_p10), %v1508_v0  ;;  %v1622_v2 = vmov (!%p195_p10), 65535   ;;  %s238_s8 = sshra.s32 (!%p195_p10), %s1268_s7, 3  ;;  %vm481_vm2 = vcmask (!%p195_p10), 220160   ;;  %v1786_v38 = vld [vmem:[%s2048_s2] ss:$0 sm:$0xff] (!%p195_p10) }
  0x10   : > { %1379 = vmatpush3.bf16.msra.mxu0 (!%p195_p10), %v1508_v0  ;;  %1448 = vmatpush3.bf16.msra.mxu1 (!%p195_p10), %v1508_v0  ;;  %v580_v3 = vsel (!%p195_p10), %vm578_vm0, 4294967295, %v1622_v2  ;;  %s1269_s9 = sshll.u32 (!%p195_p10), %s238_s8, 2  ;;  %s222_s13 = sand.u32 (!%p195_p10), 1, %s1604_s16   ;;  %v1791_v40 = vld [vmem:[%s2049_s3] ss:$0 sm:$0xff] (!%p195_p10) }
  0x11   : > { %v581_v4 = vsel (!%p195_p10), %vm579_vm1, %v580_v3, 0  ;;  %s1716_s12 = scalar_lea.vmem (!%p195_p10), %s2046_s0, %s1269_s9  ;;  %s1267_s26 = sshll.u32 (!%p195_p10), %s222_s13, 9 }
  0x12   : > { %v583_v5 = vand.u32 (!%p195_p10), %v1509_v1, %v581_v4  ;;  %v1510_v6 = vld [vmem:[%s1716_s12] sm:$0xff] (!%p195_p10)   ;;  %v1512_v8 = vld [vmem:[%s1716_s12 + $0x8] sm:$0xff] (!%p195_p10)   ;;  %v1514_v10 = vld [vmem:[%s1716_s12 + $0x10] sm:$0xff] (!%p195_p10)   ;;  %s1811_s29 = scalar_lea.vmem (!%p195_p10), [#allocation2], %s1267_s26  ;;  %s1343_s30 = sshll.u32 (!%p195_p10), %s1612_s18, 13 }
  0x13   : > { %v1511_v7 = vld [vmem:[%s1716_s12 + $0x80] sm:$0xff] (!%p195_p10)   ;;  %1382 = vmatprep.mubr.msk.bf16.mxu0 (!%p195_p10), %vm481_vm2, %v1510_v6  ;;  %v1513_v9 = vld [vmem:[%s1716_s12 + $0x88] sm:$0xff] (!%p195_p10)   ;;  %v1515_v11 = vld [vmem:[%s1716_s12 + $0x90] sm:$0xff] (!%p195_p10)   ;;  %s1159_s5 = sshll.u32 (!%p195_p10), %s1811_s29, 4  ;;  %s1988_s7 = scalar_lea.hbm (!%p195_p10), %s2050_s4, %s1343_s30  ;;  %s1990_s5 = int_to_ptr.vmem [resolvable:$true] %s1159_s5 }
  0x14   : > { %1380 = vmatprep.subr.bf16.mxu0 (!%p195_p10), %v583_v5  ;;  %1447 = vmatprep.subr.bf16.mxu1 (!%p195_p10), %v583_v5  ;;  %v1516_v12 = vld [vmem:[%s1716_s12 + $0x18] sm:$0xff] (!%p195_p10)   ;;  %v1518_v14 = vld [vmem:[%s1716_s12 + $0x20] sm:$0xff] (!%p195_p10)   ;;  %v1520_v16 = vld [vmem:[%s1716_s12 + $0x28] sm:$0xff] (!%p195_p10)   ;;  %s2000_s8 = scalar_lea.sflag (!%p195_p10), [#allocation3], %s222_s13  ;;  %s1542_s9 = scalar_lea.vmem (!%p195_p10), %s1990_s5, 8192 }
  0x15   : > { %1381 = vmatpush3.bf16.msra.mxu0 (!%p195_p10), %v583_v5  ;;  %1449 = vmatpush3.bf16.msra.mxu1 (!%p195_p10), %v583_v5  ;;  %v1517_v13 = vld [vmem:[%s1716_s12 + $0x98] sm:$0xff] (!%p195_p10)   ;;  %v1519_v15 = vld [vmem:[%s1716_s12 + $0xa0] sm:$0xff] (!%p195_p10)   ;;  %v1521_v17 = vld [vmem:[%s1716_s12 + $0xa8] sm:$0xff] (!%p195_p10)   ;;  %p1543_p11 = scmp.ne.s32.totalorder (!%p195_p10), %s1990_s5, %s1542_s9  ;;  %s1623_s10 = smov (!%p195_p10), [#allocation2]  }
  0x16   : > { %1414 = vmatprep.mubr.msk.bf16.mxu1 %vm481_vm2, %v1511_v7  ;;  %v1522_v18 = vld [vmem:[%s1716_s12 + $0x30] sm:$0xff]   ;;  %v1524_v20 = vld [vmem:[%s1716_s12 + $0x38] sm:$0xff]   ;;  %v1526_v22 = vld [vmem:[%s1716_s12 + $0x40] sm:$0xff]   ;;  %s1546_s11 = sshll.u32 %s1623_s10, 4  ;;  %s1547_s11 = int_to_ptr.vmem [resolvable:$false] %s1546_s11 }
  0x17   : > { %v1523_v19 = vld [vmem:[%s1716_s12 + $0xb0] sm:$0xff]   ;;  %v1525_v21 = vld [vmem:[%s1716_s12 + $0xb8] sm:$0xff]   ;;  %v1527_v23 = vld [vmem:[%s1716_s12 + $0xc0] sm:$0xff]   ;;  %p1544_p12 = pnand %p1543_p11, %p1691_p4  ;;  %p1549_p0 = scmp.lt.s32.totalorder %s1990_s5, %s1547_s11 }
  0x18   : > { %1383 = vmatmul.mubr.msk.bf16.vlgmr.msra.gmra.mrb[0].mxu0 %vm481_vm2, %v1512_v8  ;;  %1415 = vmatmul.mubr.msk.bf16.vlgmr.msra.gmra.mrb[0].mxu1 %vm481_vm2, %v1513_v9  ;;  %v1528_v24 = vld [vmem:[%s1716_s12 + $0x48] sm:$0xff]   ;;  %v1530_v26 = vld [vmem:[%s1716_s12 + $0x50] sm:$0xff]   ;;  %v1532_v28 = vld [vmem:[%s1716_s12 + $0x58] sm:$0xff]  }
  0x19   : > { %1386 = vmatprep.mubr.msk.bf16.mxu0 %vm481_vm2, %v1514_v10  ;;  %1418 = vmatprep.mubr.msk.bf16.mxu1 %vm481_vm2, %v1515_v11  ;;  %v1529_v25 = vld [vmem:[%s1716_s12 + $0xc8] sm:$0xff]   ;;  %v1531_v27 = vld [vmem:[%s1716_s12 + $0xd0] sm:$0xff]   ;;  %v1533_v29 = vld [vmem:[%s1716_s12 + $0xd8] sm:$0xff]   ;;  %p1545_p13 = pneg %p1544_p12 }
  0x1a   : > { %v1534_v30 = vld [vmem:[%s1716_s12 + $0x60] sm:$0xff]   ;;  %v1536_v32 = vld [vmem:[%s1716_s12 + $0x68] sm:$0xff]   ;;  %v1538_v34 = vld [vmem:[%s1716_s12 + $0x70] sm:$0xff]  }
  0x1b   : > { %v1535_v31 = vld [vmem:[%s1716_s12 + $0xe0] sm:$0xff]   ;;  %v1537_v33 = vld [vmem:[%s1716_s12 + $0xe8] sm:$0xff]   ;;  %v1539_v35 = vld [vmem:[%s1716_s12 + $0xf0] sm:$0xff]  }
  0x1c   : > { %v1540_v36 = vld [vmem:[%s1716_s12 + $0x78] sm:$0xff]  }
  0x1d   : > { %v1541_v37 = vld [vmem:[%s1716_s12 + $0xf8] sm:$0xff]   ;;  %s1548_s12 = scalar_lea.vmem %s1547_s11, 16384 }
  0x1e   : > { %p1550_p1 = scmp.lt.s32.totalorder %s1548_s12, %s1542_s9 }
  0x20   : > { %1387 = vmatmul.mubr.msk.bf16.gmra.mrb[4].mxu0 %vm481_vm2, %v1516_v12  ;;  %1419 = vmatmul.mubr.msk.bf16.gmra.mrb[4].mxu1 %vm481_vm2, %v1517_v13  ;;  %p1551_p2 = por %p1550_p1, %p1549_p0 }
  0x21   : > { %1390 = vmatprep.mubr.msk.bf16.mxu0 %vm481_vm2, %v1518_v14  ;;  %1422 = vmatprep.mubr.msk.bf16.mxu1 %vm481_vm2, %v1519_v15 }
  0x22   : > { %p1552_p3 = pnand %p1551_p2, %p1545_p13 }
  0x28   : > { %1391 = vmatmul.mubr.msk.bf16.gmra.mrb[8].mxu0 %vm481_vm2, %v1520_v16  ;;  %1423 = vmatmul.mubr.msk.bf16.gmra.mrb[8].mxu1 %vm481_vm2, %v1521_v17 }
  0x29   : > { %1394 = vmatprep.mubr.msk.bf16.mxu0 %vm481_vm2, %v1522_v18  ;;  %1426 = vmatprep.mubr.msk.bf16.mxu1 %vm481_vm2, %v1523_v19 }
  0x30   : > { %1395 = vmatmul.mubr.msk.bf16.gmra.mrb[12].mxu0 %vm481_vm2, %v1524_v20  ;;  %1427 = vmatmul.mubr.msk.bf16.gmra.mrb[12].mxu1 %vm481_vm2, %v1525_v21 }
  0x31   : > { %1398 = vmatprep.mubr.msk.bf16.mxu0 %vm481_vm2, %v1526_v22  ;;  %1430 = vmatprep.mubr.msk.bf16.mxu1 %vm481_vm2, %v1527_v23 }
  0x38   : > { %1399 = vmatmul.mubr.msk.bf16.gmra.mrb[16].mxu0 %vm481_vm2, %v1528_v24  ;;  %1431 = vmatmul.mubr.msk.bf16.gmra.mrb[16].mxu1 %vm481_vm2, %v1529_v25 }
  0x39   : > { %1402 = vmatprep.mubr.msk.bf16.mxu0 %vm481_vm2, %v1530_v26  ;;  %1434 = vmatprep.mubr.msk.bf16.mxu1 %vm481_vm2, %v1531_v27 }
  0x40   : > { %1403 = vmatmul.mubr.msk.bf16.gmra.mrb[20].mxu0 %vm481_vm2, %v1532_v28  ;;  %1435 = vmatmul.mubr.msk.bf16.gmra.mrb[20].mxu1 %vm481_vm2, %v1533_v29 }
  0x41   : > { %1406 = vmatprep.mubr.msk.bf16.mxu0 %vm481_vm2, %v1534_v30  ;;  %1438 = vmatprep.mubr.msk.bf16.mxu1 %vm481_vm2, %v1535_v31 }
  0x48   : > { %1407 = vmatmul.mubr.msk.bf16.gmra.mrb[24].mxu0 %vm481_vm2, %v1536_v32  ;;  %1439 = vmatmul.mubr.msk.bf16.gmra.mrb[24].mxu1 %vm481_vm2, %v1537_v33 }
  0x49   : > { %1410 = vmatprep.mubr.msk.bf16.mxu0 %vm481_vm2, %v1538_v34  ;;  %1442 = vmatprep.mubr.msk.bf16.mxu1 %vm481_vm2, %v1539_v35 }
  0x50   : > { %1411 = vmatmul.mubr.msk.bf16.gmra.mrb[28].mxu0 %vm481_vm2, %v1540_v36  ;;  %1443 = vmatmul.mubr.msk.bf16.gmra.mrb[28].mxu1 %vm481_vm2, %v1541_v37 }
  0xeb   : > { %v1384_v39 = vpop.f32.mrb[0].mxu0  ;;  %v1416_v41 = vpop.f32.mrb[0].mxu1 }
  0xec   : > { %v883_v42 = vmul.f32 %v1384_v39, %v1786_v38  ;;  %v915_v43 = vmul.f32 %v1416_v41, %v1786_v38  ;;  %v619_v44 = vpop.f32.mrb[1].mxu0  ;;  %v747_v45 = vpop.f32.mrb[1].mxu1 }
  0xed   : > { %v881_v46 = vmul.f32 %v1786_v38, %v619_v44  ;;  %v913_v47 = vmul.f32 %v1786_v38, %v747_v45  ;;  %v1385_v48 = vpop.f32.mrb[2].mxu0  ;;  %v1417_v49 = vpop.f32.mrb[2].mxu1 }
  0xee   : > { %v954_v50 = vadd.f32 %v1791_v40, %v883_v42  ;;  %v986_v51 = vadd.f32 %v1791_v40, %v915_v43  ;;  %v884_v52 = vmul.f32 %v1385_v48, %v1786_v38  ;;  %v916_v53 = vmul.f32 %v1417_v49, %v1786_v38  ;;  %v622_v54 = vpop.f32.mrb[3].mxu0  ;;  %v750_v55 = vpop.f32.mrb[3].mxu1 }
  0xef   : > { %v952_v56 = vadd.f32 %v1791_v40, %v881_v46  ;;  %v984_v57 = vadd.f32 %v1791_v40, %v913_v47  ;;  %v882_v58 = vmul.f32 %v1786_v38, %v622_v54  ;;  %v914_v59 = vmul.f32 %v1786_v38, %v750_v55 }
  0xf0   : > { %v1018_v60 = vmax.f32 %v954_v50, 0.0  ;;  %v1050_v61 = vmax.f32 %v986_v51, 0.0  ;;  %v955_v62 = vadd.f32 %v1791_v40, %v884_v52  ;;  %v987_v63 = vadd.f32 %v1791_v40, %v916_v53 }
  0xf1   : > { %v1016_v0 = vmax.f32 %v952_v56, 0.0  ;;  %v1048_v1 = vmax.f32 %v984_v57, 0.0  ;;  %v953_v2 = vadd.f32 %v1791_v40, %v882_v58  ;;  %v985_v3 = vadd.f32 %v1791_v40, %v914_v59 }
  0xf2   : > { %1082 = vst [vmem:[%s1811_s29 + $0x10] sm:$0xff] %v1018_v60  ;;  %1114 = vst [vmem:[%s1811_s29 + $0x110] sm:$0xff] %v1050_v61  ;;  %v1019_v4 = vmax.f32 %v955_v62, 0.0  ;;  %v1051_v5 = vmax.f32 %v987_v63, 0.0 }
  0xf3   : > { %1080 = vst [vmem:[%s1811_s29] sm:$0xff] %v1016_v0  ;;  %1112 = vst [vmem:[%s1811_s29 + $0x100] sm:$0xff] %v1048_v1  ;;  %v1017_v6 = vmax.f32 %v953_v2, 0.0  ;;  %v1049_v7 = vmax.f32 %v985_v3, 0.0  ;;  %v1388_v8 = vpop.f32.mrb[4].mxu0  ;;  %v1420_v9 = vpop.f32.mrb[4].mxu1 }
  0xf4   : > { %1083 = vst [vmem:[%s1811_s29 + $0x18] sm:$0xff] %v1019_v4  ;;  %1115 = vst [vmem:[%s1811_s29 + $0x118] sm:$0xff] %v1051_v5  ;;  %v887_v10 = vmul.f32 %v1388_v8, %v1786_v38  ;;  %v919_v11 = vmul.f32 %v1420_v9, %v1786_v38  ;;  %v635_v12 = vpop.f32.mrb[5].mxu0  ;;  %v763_v13 = vpop.f32.mrb[5].mxu1 }
  0xf5   : > { %1081 = vst [vmem:[%s1811_s29 + $0x8] sm:$0xff] %v1017_v6  ;;  %1113 = vst [vmem:[%s1811_s29 + $0x108] sm:$0xff] %v1049_v7  ;;  %v885_v14 = vmul.f32 %v1786_v38, %v635_v12  ;;  %v917_v15 = vmul.f32 %v1786_v38, %v763_v13  ;;  %v1389_v16 = vpop.f32.mrb[6].mxu0  ;;  %v1421_v17 = vpop.f32.mrb[6].mxu1 }
  0xf6   : > { %v958_v18 = vadd.f32 %v1791_v40, %v887_v10  ;;  %v990_v19 = vadd.f32 %v1791_v40, %v919_v11  ;;  %v888_v20 = vmul.f32 %v1389_v16, %v1786_v38  ;;  %v920_v21 = vmul.f32 %v1421_v17, %v1786_v38  ;;  %v638_v22 = vpop.f32.mrb[7].mxu0  ;;  %v766_v23 = vpop.f32.mrb[7].mxu1 }
  0xf7   : > { %v956_v24 = vadd.f32 %v1791_v40, %v885_v14  ;;  %v988_v25 = vadd.f32 %v1791_v40, %v917_v15  ;;  %v886_v26 = vmul.f32 %v1786_v38, %v638_v22  ;;  %v918_v27 = vmul.f32 %v1786_v38, %v766_v23 }
  0xf8   : > { %v1022_v28 = vmax.f32 %v958_v18, 0.0  ;;  %v1054_v29 = vmax.f32 %v990_v19, 0.0  ;;  %v959_v30 = vadd.f32 %v1791_v40, %v888_v20  ;;  %v991_v31 = vadd.f32 %v1791_v40, %v920_v21 }
  0xf9   : > { %v1020_v32 = vmax.f32 %v956_v24, 0.0  ;;  %v1052_v33 = vmax.f32 %v988_v25, 0.0  ;;  %v957_v34 = vadd.f32 %v1791_v40, %v886_v26  ;;  %v989_v35 = vadd.f32 %v1791_v40, %v918_v27 }
  0xfa   : > { %1086 = vst [vmem:[%s1811_s29 + $0x30] sm:$0xff] %v1022_v28  ;;  %1118 = vst [vmem:[%s1811_s29 + $0x130] sm:$0xff] %v1054_v29  ;;  %v1023_v36 = vmax.f32 %v959_v30, 0.0  ;;  %v1055_v37 = vmax.f32 %v991_v31, 0.0 }
  0xfb   : > { %1084 = vst [vmem:[%s1811_s29 + $0x20] sm:$0xff] %v1020_v32  ;;  %1116 = vst [vmem:[%s1811_s29 + $0x120] sm:$0xff] %v1052_v33  ;;  %v1021_v39 = vmax.f32 %v957_v34, 0.0  ;;  %v1053_v41 = vmax.f32 %v989_v35, 0.0  ;;  %v1392_v42 = vpop.f32.mrb[8].mxu0  ;;  %v1424_v43 = vpop.f32.mrb[8].mxu1 }
  0xfc   : > { %1087 = vst [vmem:[%s1811_s29 + $0x38] sm:$0xff] %v1023_v36  ;;  %1119 = vst [vmem:[%s1811_s29 + $0x138] sm:$0xff] %v1055_v37  ;;  %v891_v44 = vmul.f32 %v1392_v42, %v1786_v38  ;;  %v923_v45 = vmul.f32 %v1424_v43, %v1786_v38  ;;  %v651_v46 = vpop.f32.mrb[9].mxu0  ;;  %v779_v47 = vpop.f32.mrb[9].mxu1 }
  0xfd   : > { %1085 = vst [vmem:[%s1811_s29 + $0x28] sm:$0xff] %v1021_v39  ;;  %1117 = vst [vmem:[%s1811_s29 + $0x128] sm:$0xff] %v1053_v41  ;;  %v889_v48 = vmul.f32 %v1786_v38, %v651_v46  ;;  %v921_v49 = vmul.f32 %v1786_v38, %v779_v47  ;;  %v1393_v50 = vpop.f32.mrb[10].mxu0  ;;  %v1425_v51 = vpop.f32.mrb[10].mxu1 }
  0xfe   : > { %v962_v52 = vadd.f32 %v1791_v40, %v891_v44  ;;  %v994_v53 = vadd.f32 %v1791_v40, %v923_v45  ;;  %v892_v54 = vmul.f32 %v1393_v50, %v1786_v38  ;;  %v924_v55 = vmul.f32 %v1425_v51, %v1786_v38  ;;  %v654_v56 = vpop.f32.mrb[11].mxu0  ;;  %v782_v57 = vpop.f32.mrb[11].mxu1 }
  0xff   : > { %v960_v58 = vadd.f32 %v1791_v40, %v889_v48  ;;  %v992_v59 = vadd.f32 %v1791_v40, %v921_v49  ;;  %v890_v60 = vmul.f32 %v1786_v38, %v654_v56  ;;  %v922_v61 = vmul.f32 %v1786_v38, %v782_v57 }
 0x100   : > { %v1026_v62 = vmax.f32 %v962_v52, 0.0  ;;  %v1058_v63 = vmax.f32 %v994_v53, 0.0  ;;  %v963_v0 = vadd.f32 %v1791_v40, %v892_v54  ;;  %v995_v1 = vadd.f32 %v1791_v40, %v924_v55 }
 0x101   : > { %v1024_v2 = vmax.f32 %v960_v58, 0.0  ;;  %v1056_v3 = vmax.f32 %v992_v59, 0.0  ;;  %v961_v4 = vadd.f32 %v1791_v40, %v890_v60  ;;  %v993_v5 = vadd.f32 %v1791_v40, %v922_v61 }
 0x102   : > { %1090 = vst [vmem:[%s1811_s29 + $0x50] sm:$0xff] %v1026_v62  ;;  %1122 = vst [vmem:[%s1811_s29 + $0x150] sm:$0xff] %v1058_v63  ;;  %v1027_v6 = vmax.f32 %v963_v0, 0.0  ;;  %v1059_v7 = vmax.f32 %v995_v1, 0.0 }
 0x103   : > { %1088 = vst [vmem:[%s1811_s29 + $0x40] sm:$0xff] %v1024_v2  ;;  %1120 = vst [vmem:[%s1811_s29 + $0x140] sm:$0xff] %v1056_v3  ;;  %v1025_v8 = vmax.f32 %v961_v4, 0.0  ;;  %v1057_v9 = vmax.f32 %v993_v5, 0.0  ;;  %v1396_v10 = vpop.f32.mrb[12].mxu0  ;;  %v1428_v11 = vpop.f32.mrb[12].mxu1 }
 0x104   : > { %1091 = vst [vmem:[%s1811_s29 + $0x58] sm:$0xff] %v1027_v6  ;;  %1123 = vst [vmem:[%s1811_s29 + $0x158] sm:$0xff] %v1059_v7  ;;  %v895_v12 = vmul.f32 %v1396_v10, %v1786_v38  ;;  %v927_v13 = vmul.f32 %v1428_v11, %v1786_v38  ;;  %v667_v14 = vpop.f32.mrb[13].mxu0  ;;  %v795_v15 = vpop.f32.mrb[13].mxu1 }
 0x105   : > { %1089 = vst [vmem:[%s1811_s29 + $0x48] sm:$0xff] %v1025_v8  ;;  %1121 = vst [vmem:[%s1811_s29 + $0x148] sm:$0xff] %v1057_v9  ;;  %v893_v16 = vmul.f32 %v1786_v38, %v667_v14  ;;  %v925_v17 = vmul.f32 %v1786_v38, %v795_v15  ;;  %v1397_v18 = vpop.f32.mrb[14].mxu0  ;;  %v1429_v19 = vpop.f32.mrb[14].mxu1 }
 0x106   : > { %v966_v20 = vadd.f32 %v1791_v40, %v895_v12  ;;  %v998_v21 = vadd.f32 %v1791_v40, %v927_v13  ;;  %v896_v22 = vmul.f32 %v1397_v18, %v1786_v38  ;;  %v928_v23 = vmul.f32 %v1429_v19, %v1786_v38  ;;  %v670_v24 = vpop.f32.mrb[15].mxu0  ;;  %v798_v25 = vpop.f32.mrb[15].mxu1 }
 0x107   : > { %v964_v26 = vadd.f32 %v1791_v40, %v893_v16  ;;  %v996_v27 = vadd.f32 %v1791_v40, %v925_v17  ;;  %v894_v28 = vmul.f32 %v1786_v38, %v670_v24  ;;  %v926_v29 = vmul.f32 %v1786_v38, %v798_v25 }
 0x108   : > { %v1030_v30 = vmax.f32 %v966_v20, 0.0  ;;  %v1062_v31 = vmax.f32 %v998_v21, 0.0  ;;  %v967_v32 = vadd.f32 %v1791_v40, %v896_v22  ;;  %v999_v33 = vadd.f32 %v1791_v40, %v928_v23 }
 0x109   : > { %v1028_v34 = vmax.f32 %v964_v26, 0.0  ;;  %v1060_v35 = vmax.f32 %v996_v27, 0.0  ;;  %v965_v36 = vadd.f32 %v1791_v40, %v894_v28  ;;  %v997_v37 = vadd.f32 %v1791_v40, %v926_v29 }
 0x10a   : > { %1094 = vst [vmem:[%s1811_s29 + $0x70] sm:$0xff] %v1030_v30  ;;  %1126 = vst [vmem:[%s1811_s29 + $0x170] sm:$0xff] %v1062_v31  ;;  %v1031_v39 = vmax.f32 %v967_v32, 0.0  ;;  %v1063_v41 = vmax.f32 %v999_v33, 0.0 }
 0x10b   : > { %1092 = vst [vmem:[%s1811_s29 + $0x60] sm:$0xff] %v1028_v34  ;;  %1124 = vst [vmem:[%s1811_s29 + $0x160] sm:$0xff] %v1060_v35  ;;  %v1029_v42 = vmax.f32 %v965_v36, 0.0  ;;  %v1061_v43 = vmax.f32 %v997_v37, 0.0  ;;  %v1400_v44 = vpop.f32.mrb[16].mxu0  ;;  %v1432_v45 = vpop.f32.mrb[16].mxu1 }
 0x10c   : > { %1095 = vst [vmem:[%s1811_s29 + $0x78] sm:$0xff] %v1031_v39  ;;  %1127 = vst [vmem:[%s1811_s29 + $0x178] sm:$0xff] %v1063_v41  ;;  %v899_v46 = vmul.f32 %v1400_v44, %v1786_v38  ;;  %v931_v47 = vmul.f32 %v1432_v45, %v1786_v38  ;;  %v683_v48 = vpop.f32.mrb[17].mxu0  ;;  %v811_v49 = vpop.f32.mrb[17].mxu1 }
 0x10d   : > { %1093 = vst [vmem:[%s1811_s29 + $0x68] sm:$0xff] %v1029_v42  ;;  %1125 = vst [vmem:[%s1811_s29 + $0x168] sm:$0xff] %v1061_v43  ;;  %v897_v50 = vmul.f32 %v1786_v38, %v683_v48  ;;  %v929_v51 = vmul.f32 %v1786_v38, %v811_v49  ;;  %v1401_v52 = vpop.f32.mrb[18].mxu0  ;;  %v1433_v53 = vpop.f32.mrb[18].mxu1 }
 0x10e   : > { %v970_v54 = vadd.f32 %v1791_v40, %v899_v46  ;;  %v1002_v55 = vadd.f32 %v1791_v40, %v931_v47  ;;  %v900_v56 = vmul.f32 %v1401_v52, %v1786_v38  ;;  %v932_v57 = vmul.f32 %v1433_v53, %v1786_v38  ;;  %v686_v58 = vpop.f32.mrb[19].mxu0  ;;  %v814_v59 = vpop.f32.mrb[19].mxu1 }
 0x10f   : > { %v968_v60 = vadd.f32 %v1791_v40, %v897_v50  ;;  %v1000_v61 = vadd.f32 %v1791_v40, %v929_v51  ;;  %v898_v62 = vmul.f32 %v1786_v38, %v686_v58  ;;  %v930_v63 = vmul.f32 %v1786_v38, %v814_v59 }
 0x110   : > { %v1034_v0 = vmax.f32 %v970_v54, 0.0  ;;  %v1066_v1 = vmax.f32 %v1002_v55, 0.0  ;;  %v971_v2 = vadd.f32 %v1791_v40, %v900_v56  ;;  %v1003_v3 = vadd.f32 %v1791_v40, %v932_v57 }
 0x111   : > { %v1032_v4 = vmax.f32 %v968_v60, 0.0  ;;  %v1064_v5 = vmax.f32 %v1000_v61, 0.0  ;;  %v969_v6 = vadd.f32 %v1791_v40, %v898_v62  ;;  %v1001_v7 = vadd.f32 %v1791_v40, %v930_v63 }
 0x112   : > { %1098 = vst [vmem:[%s1811_s29 + $0x90] sm:$0xff] %v1034_v0  ;;  %1130 = vst [vmem:[%s1811_s29 + $0x190] sm:$0xff] %v1066_v1  ;;  %v1035_v8 = vmax.f32 %v971_v2, 0.0  ;;  %v1067_v9 = vmax.f32 %v1003_v3, 0.0 }
 0x113   : > { %1096 = vst [vmem:[%s1811_s29 + $0x80] sm:$0xff] %v1032_v4  ;;  %1128 = vst [vmem:[%s1811_s29 + $0x180] sm:$0xff] %v1064_v5  ;;  %v1033_v10 = vmax.f32 %v969_v6, 0.0  ;;  %v1065_v11 = vmax.f32 %v1001_v7, 0.0  ;;  %v1404_v12 = vpop.f32.mrb[20].mxu0  ;;  %v1436_v13 = vpop.f32.mrb[20].mxu1 }
 0x114   : > { %1099 = vst [vmem:[%s1811_s29 + $0x98] sm:$0xff] %v1035_v8  ;;  %1131 = vst [vmem:[%s1811_s29 + $0x198] sm:$0xff] %v1067_v9  ;;  %v903_v14 = vmul.f32 %v1404_v12, %v1786_v38  ;;  %v935_v15 = vmul.f32 %v1436_v13, %v1786_v38  ;;  %v699_v16 = vpop.f32.mrb[21].mxu0  ;;  %v827_v17 = vpop.f32.mrb[21].mxu1 }
 0x115   : > { %1097 = vst [vmem:[%s1811_s29 + $0x88] sm:$0xff] %v1033_v10  ;;  %1129 = vst [vmem:[%s1811_s29 + $0x188] sm:$0xff] %v1065_v11  ;;  %v901_v18 = vmul.f32 %v1786_v38, %v699_v16  ;;  %v933_v19 = vmul.f32 %v1786_v38, %v827_v17  ;;  %v1405_v20 = vpop.f32.mrb[22].mxu0  ;;  %v1437_v21 = vpop.f32.mrb[22].mxu1 }
 0x116   : > { %v974_v22 = vadd.f32 %v1791_v40, %v903_v14  ;;  %v1006_v23 = vadd.f32 %v1791_v40, %v935_v15  ;;  %v904_v24 = vmul.f32 %v1405_v20, %v1786_v38  ;;  %v936_v25 = vmul.f32 %v1437_v21, %v1786_v38  ;;  %v702_v26 = vpop.f32.mrb[23].mxu0  ;;  %v830_v27 = vpop.f32.mrb[23].mxu1 }
 0x117   : > { %v972_v28 = vadd.f32 %v1791_v40, %v901_v18  ;;  %v1004_v29 = vadd.f32 %v1791_v40, %v933_v19  ;;  %v902_v30 = vmul.f32 %v1786_v38, %v702_v26  ;;  %v934_v31 = vmul.f32 %v1786_v38, %v830_v27 }
 0x118   : > { %v1038_v32 = vmax.f32 %v974_v22, 0.0  ;;  %v1070_v33 = vmax.f32 %v1006_v23, 0.0  ;;  %v975_v34 = vadd.f32 %v1791_v40, %v904_v24  ;;  %v1007_v35 = vadd.f32 %v1791_v40, %v936_v25 }
 0x119   : > { %v1036_v36 = vmax.f32 %v972_v28, 0.0  ;;  %v1068_v37 = vmax.f32 %v1004_v29, 0.0  ;;  %v973_v39 = vadd.f32 %v1791_v40, %v902_v30  ;;  %v1005_v41 = vadd.f32 %v1791_v40, %v934_v31 }
 0x11a   : > { %1102 = vst [vmem:[%s1811_s29 + $0xb0] sm:$0xff] %v1038_v32  ;;  %1134 = vst [vmem:[%s1811_s29 + $0x1b0] sm:$0xff] %v1070_v33  ;;  %v1039_v42 = vmax.f32 %v975_v34, 0.0  ;;  %v1071_v43 = vmax.f32 %v1007_v35, 0.0 }
 0x11b   : > { %1100 = vst [vmem:[%s1811_s29 + $0xa0] sm:$0xff] %v1036_v36  ;;  %1132 = vst [vmem:[%s1811_s29 + $0x1a0] sm:$0xff] %v1068_v37  ;;  %v1037_v44 = vmax.f32 %v973_v39, 0.0  ;;  %v1069_v45 = vmax.f32 %v1005_v41, 0.0  ;;  %v1408_v46 = vpop.f32.mrb[24].mxu0  ;;  %v1440_v47 = vpop.f32.mrb[24].mxu1 }
 0x11c   : > { %1103 = vst [vmem:[%s1811_s29 + $0xb8] sm:$0xff] %v1039_v42  ;;  %1135 = vst [vmem:[%s1811_s29 + $0x1b8] sm:$0xff] %v1071_v43  ;;  %v907_v48 = vmul.f32 %v1408_v46, %v1786_v38  ;;  %v939_v49 = vmul.f32 %v1440_v47, %v1786_v38  ;;  %v715_v50 = vpop.f32.mrb[25].mxu0  ;;  %v843_v51 = vpop.f32.mrb[25].mxu1 }
 0x11d   : > { %1101 = vst [vmem:[%s1811_s29 + $0xa8] sm:$0xff] %v1037_v44  ;;  %1133 = vst [vmem:[%s1811_s29 + $0x1a8] sm:$0xff] %v1069_v45  ;;  %v905_v52 = vmul.f32 %v1786_v38, %v715_v50  ;;  %v937_v53 = vmul.f32 %v1786_v38, %v843_v51  ;;  %v1409_v54 = vpop.f32.mrb[26].mxu0  ;;  %v1441_v55 = vpop.f32.mrb[26].mxu1 }
 0x11e   : > { %v978_v56 = vadd.f32 %v1791_v40, %v907_v48  ;;  %v1010_v57 = vadd.f32 %v1791_v40, %v939_v49  ;;  %v908_v58 = vmul.f32 %v1409_v54, %v1786_v38  ;;  %v940_v59 = vmul.f32 %v1441_v55, %v1786_v38  ;;  %v718_v60 = vpop.f32.mrb[27].mxu0  ;;  %v846_v61 = vpop.f32.mrb[27].mxu1 }
 0x11f   : > { %v976_v62 = vadd.f32 %v1791_v40, %v905_v52  ;;  %v1008_v63 = vadd.f32 %v1791_v40, %v937_v53  ;;  %v906_v0 = vmul.f32 %v1786_v38, %v718_v60  ;;  %v938_v1 = vmul.f32 %v1786_v38, %v846_v61 }
 0x120   : > { %v1042_v2 = vmax.f32 %v978_v56, 0.0  ;;  %v1074_v3 = vmax.f32 %v1010_v57, 0.0  ;;  %v979_v4 = vadd.f32 %v1791_v40, %v908_v58  ;;  %v1011_v5 = vadd.f32 %v1791_v40, %v940_v59 }
 0x121   : > { %v1040_v6 = vmax.f32 %v976_v62, 0.0  ;;  %v1072_v7 = vmax.f32 %v1008_v63, 0.0  ;;  %v977_v8 = vadd.f32 %v1791_v40, %v906_v0  ;;  %v1009_v9 = vadd.f32 %v1791_v40, %v938_v1 }
 0x122   : > { %1106 = vst [vmem:[%s1811_s29 + $0xd0] sm:$0xff] %v1042_v2  ;;  %1138 = vst [vmem:[%s1811_s29 + $0x1d0] sm:$0xff] %v1074_v3  ;;  %v1043_v10 = vmax.f32 %v979_v4, 0.0  ;;  %v1075_v11 = vmax.f32 %v1011_v5, 0.0 }
 0x123   : > { %1104 = vst [vmem:[%s1811_s29 + $0xc0] sm:$0xff] %v1040_v6  ;;  %1136 = vst [vmem:[%s1811_s29 + $0x1c0] sm:$0xff] %v1072_v7  ;;  %v1041_v12 = vmax.f32 %v977_v8, 0.0  ;;  %v1073_v13 = vmax.f32 %v1009_v9, 0.0  ;;  %v1412_v14 = vpop.f32.mrb[28].mxu0  ;;  %v1444_v15 = vpop.f32.mrb[28].mxu1 }
 0x124   : > { %1107 = vst [vmem:[%s1811_s29 + $0xd8] sm:$0xff] %v1043_v10  ;;  %1139 = vst [vmem:[%s1811_s29 + $0x1d8] sm:$0xff] %v1075_v11  ;;  %v911_v16 = vmul.f32 %v1412_v14, %v1786_v38  ;;  %v943_v17 = vmul.f32 %v1444_v15, %v1786_v38  ;;  %v731_v18 = vpop.f32.mrb[29].mxu0  ;;  %v859_v19 = vpop.f32.mrb[29].mxu1 }
 0x125   : > { %1105 = vst [vmem:[%s1811_s29 + $0xc8] sm:$0xff] %v1041_v12  ;;  %1137 = vst [vmem:[%s1811_s29 + $0x1c8] sm:$0xff] %v1073_v13  ;;  %v909_v20 = vmul.f32 %v1786_v38, %v731_v18  ;;  %v941_v21 = vmul.f32 %v1786_v38, %v859_v19  ;;  %v1413_v22 = vpop.f32.mrb[30].mxu0  ;;  %v1445_v23 = vpop.f32.mrb[30].mxu1 }
 0x126   : > { %v982_v24 = vadd.f32 %v1791_v40, %v911_v16  ;;  %v1014_v25 = vadd.f32 %v1791_v40, %v943_v17  ;;  %v912_v26 = vmul.f32 %v1413_v22, %v1786_v38  ;;  %v944_v27 = vmul.f32 %v1445_v23, %v1786_v38  ;;  %v734_v28 = vpop.f32.mrb[31].mxu0  ;;  %v862_v29 = vpop.f32.mrb[31].mxu1 }
 0x127   : > { %v980_v30 = vadd.f32 %v1791_v40, %v909_v20  ;;  %v1012_v31 = vadd.f32 %v1791_v40, %v941_v21  ;;  %v910_v32 = vmul.f32 %v1786_v38, %v734_v28  ;;  %v942_v33 = vmul.f32 %v1786_v38, %v862_v29 }
 0x128   : > { %v1046_v34 = vmax.f32 %v982_v24, 0.0  ;;  %v1078_v35 = vmax.f32 %v1014_v25, 0.0  ;;  %v983_v36 = vadd.f32 %v1791_v40, %v912_v26  ;;  %v1015_v37 = vadd.f32 %v1791_v40, %v944_v27 }
 0x129   : > { %v1044_v39 = vmax.f32 %v980_v30, 0.0  ;;  %v1076_v41 = vmax.f32 %v1012_v31, 0.0  ;;  %v981_v42 = vadd.f32 %v1791_v40, %v910_v32  ;;  %v1013_v38 = vadd.f32 %v1791_v40, %v942_v33 }
 0x12a   : > { %1110 = vst [vmem:[%s1811_s29 + $0xf0] sm:$0xff] %v1046_v34  ;;  %1142 = vst [vmem:[%s1811_s29 + $0x1f0] sm:$0xff] %v1078_v35  ;;  %v1047_v43 = vmax.f32 %v983_v36, 0.0  ;;  %v1079_v44 = vmax.f32 %v1015_v37, 0.0 }
 0x12b   : > { %1108 = vst [vmem:[%s1811_s29 + $0xe0] sm:$0xff] %v1044_v39  ;;  %1140 = vst [vmem:[%s1811_s29 + $0x1e0] sm:$0xff] %v1076_v41  ;;  %v1045_v45 = vmax.f32 %v981_v42, 0.0  ;;  %v1077_v46 = vmax.f32 %v1013_v38, 0.0 }
 0x12c   : > { %1111 = vst [vmem:[%s1811_s29 + $0xf8] sm:$0xff] %v1047_v43  ;;  %1143 = vst [vmem:[%s1811_s29 + $0x1f8] sm:$0xff] %v1079_v44 }
 0x12d   : > { %1109 = vst [vmem:[%s1811_s29 + $0xe8] sm:$0xff] %v1045_v45  ;;  %1141 = vst [vmem:[%s1811_s29 + $0x1e8] sm:$0xff] %v1077_v46 }
 0x12e   : > { %1555 = shalt.err (!%p1552_p3)
}
 0x12f   : > { %s1556_s13 = scalar_lea.hbm %s1988_s7, 8192  ;;  %s1560_s22 = scalar_lea.hbm %s2050_s4, 16384 }
 0x130   : > { %p1557_p5 = scmp.ne.s32.totalorder %s1988_s7, %s1556_s13  ;;  %p1561_p9 = scmp.lt.u32.totalorder %s1988_s7, %s2050_s4 }
 0x131   : > { %p1562_p10 = scmp.lt.u32.totalorder %s1560_s22, %s1556_s13  ;;  %p1564_p12 = scmp.lt.u32.totalorder %s1556_s13, %s1988_s7 }
 0x132   : > { %p1558_p6 = pnand %p1557_p5, %p1691_p4 }
 0x133   : > { %p1563_p11 = por %p1562_p10, %p1561_p9 }
 0x134   : > { %p1559_p7 = pneg %p1558_p6 }
 0x135   : > { %p1565_p13 = por %p1564_p12, %p1563_p11 }
 0x137   : > { %p1566_p0 = pnand %p1565_p13, %p1559_p7 }
 0x139   : > { %1569 = shalt.err (!%p1566_p0)
}
 0x13a   : > { %s1624_s29 = smov 128   ;;  %s1625_s30 = smov 8  }
 0x13b   : > { %1450 = dma.vmem_to_hbm [thread:$0]  (%p1691_p4), %s1990_s5, 8192, %s1988_s7, %s2000_s8, %s1624_s29, %s1624_s29, %s1625_s30  }
 0x13c PF: > { %p1456_p1 = scmp.ge.s32.totalorder %s1620_s20, 2  ;;  %s1174_s18 = sand.u32 1, %s1600_s15  }
 0x13d   : > { %s1175_s6 = scalar_lea.sflag [#allocation3], %s1174_s18 }
 0x13e   : > { %p1453_p2 = pnand %p1456_p1, %p1698_p8 }
 0x140   : > { %1595 = dma.done.wait (!%p1453_p2), %s1175_s6, 8192  }
 0x141   : > { %1597 = vsyncadd (!%p1453_p2), %s1175_s6, 4294959104  ;;  %s17_s20 = sadd.s32 1, %s1620_s20   ;;  %s2053_s15 = smov %s1604_s16 }
 0x142   : > { %p14_p3 = scmp.ge.s32.totalorder %s17_s20, 4   ;;  %s2054_s16 = smov %s1608_s17 }
 0x143   : > { %s2055_s17 = smov %s1704_s28  ;;  %s2056_s18 = smov %s1616_s19 }
 0x144   : > { %s2057_s19 = smov %s2059_s23  ;;  %16 = sbr.rel (!%p14_p3) target bundleno = 4 (0x4), region = 78 }
 0x14b   :  { %1180 = vsyncpa [#allocation3], 1 }
 0x14c   :  { %1182 = vsyncpa [#allocation3 + $0x1], 1 }

</bundles_post_ra>
